<compile_context>
chip_gen: v7x
topology: tpu7x:2x2x1
jax: 0.10.0
libtpu: 0.0.40
codegen_flags: <defaults>
</compile_context>

<pallas_src>
import functools

import jax
import jax.numpy as jnp
from jax.experimental import pallas as pl
from jax.experimental.pallas import tpu as pltpu


def _round_up(n, m):
    return ((n + m - 1) // m) * m


def mlp_kernel(x_ref, w1_ref, b1_ref, w2_ref, b2_ref, o_ref):
    """One batch-tile of: softmax(relu(x @ W1 + b1) @ W2 + b2, axis=-1).

    W1/b1/W2/b2 arrive pre-padded to lane-dense (multiple-of-128) widths.
    Padded hidden columns are exact zeros (exact through ReLU and the fc2
    contraction); padded output columns carry zero weights and a -1e30 bias,
    so after exp() they contribute exactly 0 to the softmax denominator.

    Note: if B % block_b != 0 the last grid step may read garbage rows; each
    output row depends only on its own input row and out-of-bounds output
    rows are never written back, so this is contained.
    """
    x = x_ref[...]  # f32

    # fc1 + ReLU (MXU matmul, f32 accumulation).
    h = jnp.dot(x, w1_ref[...], preferred_element_type=jnp.float32)
    h = jnp.maximum(h + b1_ref[...], 0.0)

    # fc2 (full 128-lane MXU op thanks to padded class dim).
    logits = jnp.dot(h, w2_ref[...], preferred_element_type=jnp.float32)
    logits = logits + b2_ref[...]

    # Numerically stable softmax over the padded class dim.  Padded columns
    # sit at ~-1e30, so they never win the max and exp() underflows to 0.
    m = jnp.max(logits, axis=-1, keepdims=True)
    e = jnp.exp(logits - m)
    denom = jnp.sum(e, axis=-1, keepdims=True)

    n_out = o_ref.shape[-1]
    # Exact division so rows sum to 1 to f32 precision.
    o_ref[...] = (e[:, :n_out] / denom).astype(o_ref.dtype)


def prepare_params(w1, b1, w2, b2):
    """One-time lane-dense padding of the parameters (outside the hot path).

    Padded output classes get zero weights and a -1e30 bias: after the max
    subtraction their exp() is exactly 0.  (Assumes real logits never get
    anywhere near 1e30 in magnitude, which holds for any sane model.)
    Returns (w1p, b1p, w2p, b2p, n_out).
    """
    w1 = jnp.asarray(w1, jnp.float32)
    w2 = jnp.asarray(w2, jnp.float32)
    b1 = jnp.asarray(b1, jnp.float32).reshape(1, -1)
    b2 = jnp.asarray(b2, jnp.float32).reshape(1, -1)

    d_in, feats = w1.shape
    n_out = int(w2.shape[1])
    feats_p = _round_up(feats, 128)
    n_out_p = _round_up(n_out, 128)

    w1p = jnp.pad(w1, ((0, 0), (0, feats_p - feats)))
    b1p = jnp.pad(b1, ((0, 0), (0, feats_p - feats)))
    w2p = jnp.pad(w2, ((0, feats_p - feats), (0, n_out_p - n_out)))
    b2p = jnp.pad(b2, ((0, 0), (0, n_out_p - n_out)),
                  constant_values=jnp.float32(-1e30))
    return w1p, b1p, w2p, b2p, n_out


def _default_block_b(B):
    # Single grid step for small/medium batches (amortizes the ~0.35us/step
    # pipeline overhead).  For large batches, cap the tile at 2048 rows and
    # guarantee >=2 grid steps so the "parallel" grid axis can shard across
    # v7x's two TensorCores; the extra step is noise on v5e/v6e at that size.
    if B <= 1024:
        return B
    half = _round_up(pl.cdiv(B, 2), 8)
    return min(half, 2048)


@functools.partial(jax.jit, static_argnames=("n_out", "block_b"))
def mlp_forward(x, w1p, b1p, w2p, b2p, *, n_out, block_b=None):
    B, d_in = x.shape
    feats_p = w1p.shape[1]
    n_out_p = w2p.shape[1]

    if block_b is None:
        block_b = _default_block_b(B)
    block_b = min(block_b, B)
    if block_b < B:
        # (8,128) rule: a partial batch tile must be a multiple of 8 sublanes.
        block_b = max(8, (block_b // 8) * 8)

    grid = (pl.cdiv(B, block_b),)

    # NOTE: weight/bias index_maps are constant, so Pallas does not re-DMA
    # them across grid steps; VMEM footprint here is tiny so the default
    # double-buffering is left alone.
    return pl.pallas_call(
        mlp_kernel,
        out_shape=jax.ShapeDtypeStruct((B, n_out), jnp.float32),
        grid_spec=pltpu.PrefetchScalarGridSpec(
            num_scalar_prefetch=0,
            grid=grid,
            in_specs=[
                pl.BlockSpec((block_b, d_in), lambda i: (i, 0)),     # x tile
                pl.BlockSpec((d_in, feats_p), lambda i: (0, 0)),     # W1 (full)
                pl.BlockSpec((1, feats_p), lambda i: (0, 0)),        # b1
                pl.BlockSpec((feats_p, n_out_p), lambda i: (0, 0)),  # W2 (full)
                pl.BlockSpec((1, n_out_p), lambda i: (0, 0)),        # b2
            ],
            # n_out equals the full last dim, so an un-padded output block is
            # legal; this avoids writing (and re-slicing) a 128-wide pad.
            out_specs=pl.BlockSpec((block_b, n_out), lambda i: (i, 0)),
        ),
        compiler_params=pltpu.CompilerParams(
            dimension_semantics=("parallel",)),
    )(x, w1p, b1p, w2p, b2p)


def init_params(key, d_in, feats, n_out=2):
    """Deterministic PyTorch-style (uniform +-1/sqrt(fan_in)) init."""
    k1, k2, k3, k4 = jax.random.split(key, 4)
    bound1 = 1.0 / jnp.sqrt(d_in)
    bound2 = 1.0 / jnp.sqrt(feats)
    w1 = jax.random.uniform(k1, (d_in, feats), jnp.float32, -bound1, bound1)
    b1 = jax.random.uniform(k2, (1, feats), jnp.float32, -bound1, bound1)
    w2 = jax.random.uniform(k3, (feats, n_out), jnp.float32, -bound2, bound2)
    b2 = jax.random.uniform(k4, (1, n_out), jnp.float32, -bound2, bound2)
    return w1, b1, w2, b2


if __name__ == "__main__":
    # MLP(input=32, features=64, dropoutRate=0.1); batch = 16.
    B, D_IN, FEATS = 16, 32, 64

    key = jax.random.PRNGKey(0)
    kx, kp = jax.random.split(key)
    x = jax.random.normal(kx, (B, D_IN), dtype=jnp.float32)
    w1, b1, w2, b2 = init_params(kp, D_IN, FEATS)

    # One-time parameter prep (padding) outside the hot forward path.
    w1p, b1p, w2p, b2p, n_out = prepare_params(w1, b1, w2, b2)

    out = mlp_forward(x, w1p, b1p, w2p, b2p, n_out=n_out)  # grid=(1,) for B=16
    out = jax.block_until_ready(out)

    # Pure-JAX reference for correctness.
    ref_h = jnp.maximum(x @ w1 + b1, 0.0)
    ref = jax.nn.softmax(ref_h @ w2 + b2, axis=1)
    assert out.shape == (B, 2)
    assert jnp.allclose(out, ref, atol=2e-3, rtol=2e-3)
    # Exact division in the kernel -> rows sum to 1 to f32 precision.
    assert jnp.allclose(jnp.sum(out, axis=1), 1.0, atol=1e-5)

    print("KERNEL_OK")
</pallas_src>

<mosaic_0001>
module attributes {stable_mosaic.version = 11 : i64} {
  func.func @mlp_kernel(%arg0: i32, %arg1: memref<16x32xf32, #tpu.memory_space<vmem>>, %arg2: memref<32x128xf32, #tpu.memory_space<vmem>>, %arg3: memref<1x128xf32, #tpu.memory_space<vmem>>, %arg4: memref<128x128xf32, #tpu.memory_space<vmem>>, %arg5: memref<1x128xf32, #tpu.memory_space<vmem>>, %arg6: memref<16x2xf32, #tpu.memory_space<vmem>>) attributes {dimension_semantics = [#tpu.dimension_semantics<parallel>], iteration_bounds = array<i64: 1>, scalar_prefetch = 0 : i64, scratch_operands = 0 : i64, tpu.core_type = #tpu.core_type<tc>, window_params = [{transform_indices = @transform_0, window_bounds = array<i64: 16, 32>}, {pipeline_mode = #tpu.pipeline_mode<synchronous>, transform_indices = @transform_1, window_bounds = array<i64: 32, 128>}, {pipeline_mode = #tpu.pipeline_mode<synchronous>, transform_indices = @transform_2, window_bounds = array<i64: 1, 128>}, {pipeline_mode = #tpu.pipeline_mode<synchronous>, transform_indices = @transform_3, window_bounds = array<i64: 128, 128>}, {pipeline_mode = #tpu.pipeline_mode<synchronous>, transform_indices = @transform_4, window_bounds = array<i64: 1, 128>}, {transform_indices = @transform_5, window_bounds = array<i64: 16, 2>}]} {
    %c0 = arith.constant 0 : index
    %c0_0 = arith.constant 0 : index
    %0 = vector.load %arg1[%c0, %c0_0] : memref<16x32xf32, #tpu.memory_space<vmem>>, vector<16x32xf32>
    %c0_1 = arith.constant 0 : index
    %c0_2 = arith.constant 0 : index
    %1 = vector.load %arg2[%c0_1, %c0_2] : memref<32x128xf32, #tpu.memory_space<vmem>>, vector<32x128xf32>
    %cst = arith.constant dense<0.000000e+00> : vector<16x128xf32>
    %2 = tpu.matmul %0, %1, %cst {dimension_numbers = #tpu.dot_dimension_numbers<[1], [0], [0], [1], [0, 0, 1, 1], [], []>} : vector<16x32xf32>, vector<32x128xf32>, vector<16x128xf32> -> vector<16x128xf32>
    %c0_3 = arith.constant 0 : index
    %c0_4 = arith.constant 0 : index
    %3 = vector.load %arg3[%c0_3, %c0_4] : memref<1x128xf32, #tpu.memory_space<vmem>>, vector<1x128xf32>
    %4 = vector.broadcast %3 : vector<1x128xf32> to vector<16x128xf32>
    %5 = arith.addf %2, %4 : vector<16x128xf32>
    %cst_5 = arith.constant 0.000000e+00 : f32
    %6 = vector.broadcast %cst_5 : f32 to vector<16x128xf32>
    %7 = arith.maximumf %5, %6 : vector<16x128xf32>
    %c0_6 = arith.constant 0 : index
    %c0_7 = arith.constant 0 : index
    %8 = vector.load %arg4[%c0_6, %c0_7] : memref<128x128xf32, #tpu.memory_space<vmem>>, vector<128x128xf32>
    %cst_8 = arith.constant dense<0.000000e+00> : vector<16x128xf32>
    %9 = tpu.matmul %7, %8, %cst_8 {dimension_numbers = #tpu.dot_dimension_numbers<[1], [0], [0], [1], [0, 0, 1, 1], [], []>} : vector<16x128xf32>, vector<128x128xf32>, vector<16x128xf32> -> vector<16x128xf32>
    %c0_9 = arith.constant 0 : index
    %c0_10 = arith.constant 0 : index
    %10 = vector.load %arg5[%c0_9, %c0_10] : memref<1x128xf32, #tpu.memory_space<vmem>>, vector<1x128xf32>
    %11 = vector.broadcast %10 : vector<1x128xf32> to vector<16x128xf32>
    %12 = arith.addf %9, %11 : vector<16x128xf32>
    %cst_11 = arith.constant dense<0xFF800000> : vector<16xf32>
    %13 = vector.multi_reduction <maximumf>, %12, %cst_11 [1] : vector<16x128xf32> to vector<16xf32>
    %14 = vector.shape_cast %13 : vector<16xf32> to vector<16x1xf32>
    %15 = vector.broadcast %14 : vector<16x1xf32> to vector<16x128xf32>
    %16 = arith.subf %12, %15 : vector<16x128xf32>
    %17 = math.exp %16 : vector<16x128xf32>
    %cst_12 = arith.constant dense<0.000000e+00> : vector<16xf32>
    %18 = vector.multi_reduction <add>, %17, %cst_12 [1] : vector<16x128xf32> to vector<16xf32>
    %19 = vector.shape_cast %18 : vector<16xf32> to vector<16x1xf32>
    %20 = vector.extract_strided_slice %17 {offsets = [0, 0], sizes = [16, 2], strides = [1, 1]} : vector<16x128xf32> to vector<16x2xf32>
    %21 = vector.broadcast %19 : vector<16x1xf32> to vector<16x2xf32>
    %22 = arith.divf %20, %21 : vector<16x2xf32>
    %c0_13 = arith.constant 0 : index
    %c0_14 = arith.constant 0 : index
    %23 = vector.load %arg6[%c0_13, %c0_14] : memref<16x2xf32, #tpu.memory_space<vmem>>, vector<16x2xf32>
    tpu.vector_store %arg6[%c0_13, %c0_14], %22 {strides = array<i32>} : memref<16x2xf32, #tpu.memory_space<vmem>>, vector<16x2xf32>,
    return
  }
  func.func @transform_0(%arg0: i32) -> (i32, i32) {
    %c0_i32 = arith.constant 0 : i32
    %c0_i32_0 = arith.constant 0 : i32
    return %arg0, %c0_i32 : i32, i32
  }
  func.func @transform_1(%arg0: i32) -> (i32, i32) {
    %c0_i32 = arith.constant 0 : i32
    %c0_i32_0 = arith.constant 0 : i32
    %c0_i32_1 = arith.constant 0 : i32
    return %c0_i32, %c0_i32_0 : i32, i32
  }
  func.func @transform_2(%arg0: i32) -> (i32, i32) {
    %c0_i32 = arith.constant 0 : i32
    %c0_i32_0 = arith.constant 0 : i32
    %c0_i32_1 = arith.constant 0 : i32
    return %c0_i32, %c0_i32_0 : i32, i32
  }
  func.func @transform_3(%arg0: i32) -> (i32, i32) {
    %c0_i32 = arith.constant 0 : i32
    %c0_i32_0 = arith.constant 0 : i32
    %c0_i32_1 = arith.constant 0 : i32
    return %c0_i32, %c0_i32_0 : i32, i32
  }
  func.func @transform_4(%arg0: i32) -> (i32, i32) {
    %c0_i32 = arith.constant 0 : i32
    %c0_i32_0 = arith.constant 0 : i32
    %c0_i32_1 = arith.constant 0 : i32
    return %c0_i32, %c0_i32_0 : i32, i32
  }
  func.func @transform_5(%arg0: i32) -> (i32, i32) {
    %c0_i32 = arith.constant 0 : i32
    %c0_i32_0 = arith.constant 0 : i32
    return %arg0, %c0_i32 : i32, i32
  }
}

</mosaic_0001>

<bundles_post_ra>
// kernel: mlp_forward.1
= control target key start
LH: loop header
LB: loop body
LE: loop exit
PB: predicated region body
PF: predicated region fallthrough
CT: control target
= control target key end

     0   :  { %10 = vsyncpa [#allocation3], 0  ;;  %s581_s0 = inlined_call_operand.hbm [shape: f32[16,32], index: 0, kind: input, shape index: {}]   ;;  %s582_s1 = inlined_call_operand.hbm [shape: f32[32,128], index: 1, kind: input, shape index: {}]   ;;  %s583_s2 = inlined_call_operand.vmem [shape: f32[1,128], index: 2, kind: input, shape index: {}]   ;;  %s584_s3 = inlined_call_operand.hbm [shape: f32[128,128], index: 3, kind: input, shape index: {}]   ;;  %s585_s4 = inlined_call_operand.vmem [shape: f32[1,128], index: 4, kind: input, shape index: {}]   ;;  %s586_s5 = inlined_call_operand.vmem [shape: f32[16,2], index: 5, kind: output, shape index: {}]  }
   0x1   :  { %11 = vsyncpa [#allocation5], 0  ;;  %s480_s18 = smov [#allocation4]   ;;  %s481_s20 = smov [#allocation2]  }
   0x2   :  { %s29_s19 = sshll.u32 %s480_s18, 4  ;;  %s17_s21 = sshll.u32 %s481_s20, 4  ;;  %s30_s19 = int_to_ptr.vmem [resolvable:$true] %s29_s19  ;;  %s515_s21 = int_to_ptr.vmem [resolvable:$true] %s17_s21 }
   0x3   :  { %s410_s24 = scalar_lea.hbm %s582_s1, 512 }
   0x4   :  { %p411_p0 = scmp.ne.s32.totalorder %s582_s1, %s410_s24  ;;  %p414_p1 = scmp.lt.u32.totalorder %s410_s24, %s582_s1 }
   0x6   :  { %p416_p2 = pnand %p414_p1, %p411_p0 }
   0x8   :  { %419 = shalt.err (!%p416_p2)
}
   0x9   :  { %s420_s29 = scalar_lea.vmem %s30_s19, 512  ;;  %p425_p4 = scmp.lt.s32.totalorder %s30_s19, %s30_s19 }
   0xa   :  { %p421_p3 = scmp.ne.s32.totalorder %s30_s19, %s420_s29  ;;  %p426_p5 = scmp.lt.s32.totalorder %s420_s29, %s420_s29 }
   0xc   :  { %p427_p6 = por %p426_p5, %p425_p4 }
   0xe   :  { %p428_p7 = pnand %p427_p6, %p421_p3 }
  0x10   :  { %431 = shalt.err (!%p428_p7)
}
  0x11   :  { %s482_s30 = smov 128   ;;  %s483_s6 = smov 8  }
  0x12   :  { %35 = dma.hbm_to_vmem [thread:$0]  %s582_s1, 512, %s30_s19, [#allocation5], %s482_s30, %s482_s30, %s483_s6  }
  0x13   :  { %s432_s11 = scalar_lea.hbm %s581_s0, 256 }
  0x14   :  { %p433_p8 = scmp.ne.s32.totalorder %s581_s0, %s432_s11  ;;  %p436_p9 = scmp.lt.u32.totalorder %s432_s11, %s581_s0 }
  0x16   :  { %p438_p10 = pnand %p436_p9, %p433_p8 }
  0x18   :  { %441 = shalt.err (!%p438_p10)
}
  0x19   :  { %s442_s16 = scalar_lea.vmem %s515_s21, 256  ;;  %p447_p12 = scmp.lt.s32.totalorder %s515_s21, %s515_s21 }
  0x1a   :  { %p443_p11 = scmp.ne.s32.totalorder %s515_s21, %s442_s16  ;;  %p448_p13 = scmp.lt.s32.totalorder %s442_s16, %s442_s16 }
  0x1c   :  { %p449_p0 = por %p448_p13, %p447_p12 }
  0x1e   :  { %p450_p1 = pnand %p449_p0, %p443_p11 }
  0x20   :  { %453 = shalt.err (!%p450_p1)
}
  0x21   :  { %23 = dma.hbm_to_vmem [thread:$0]  %s581_s0, 256, %s515_s21, [#allocation3], %s482_s30, %s482_s30, %s483_s6  }
  0x22   :  { %s484_s18 = smov [#allocation6]   ;;  %s454_s23 = scalar_lea.hbm %s584_s3, 2048 }
  0x23   :  { %s43_s19 = sshll.u32 %s484_s18, 4  ;;  %p455_p2 = scmp.ne.s32.totalorder %s584_s3, %s454_s23  ;;  %s44_s19 = int_to_ptr.vmem [resolvable:$true] %s43_s19 }
  0x24   :  { %p458_p3 = scmp.lt.u32.totalorder %s454_s23, %s584_s3 }
  0x26   :  { %p460_p4 = pnand %p458_p3, %p455_p2 }
  0x28   :  { %463 = shalt.err (!%p460_p4)
}
  0x29   :  { %s464_s28 = scalar_lea.vmem %s44_s19, 2048  ;;  %p469_p6 = scmp.lt.s32.totalorder %s44_s19, %s44_s19 }
  0x2a   :  { %p465_p5 = scmp.ne.s32.totalorder %s44_s19, %s464_s28  ;;  %p470_p7 = scmp.lt.s32.totalorder %s464_s28, %s464_s28 }
  0x2c   :  { %p471_p8 = por %p470_p7, %p469_p6 }
  0x2e   :  { %p472_p9 = pnand %p471_p8, %p465_p5 }
  0x30   :  { %475 = shalt.err (!%p472_p9)
}
  0x31   :  { %49 = dma.hbm_to_vmem [thread:$0]  %s584_s3, 2048, %s44_s19, [#allocation5], %s482_s30, %s482_s30, %s483_s6  }
  0x32   :  { %476 = dma.done.wait [#allocation3], 256  }
  0x33   :  { %477 = vsyncadd [#allocation3], 4294967040 }
  0x34   :  { %478 = dma.done.wait [#allocation5], 2560  }
  0x35   :  { %479 = vsyncadd [#allocation5], 4294964736  ;;  %vm74_vm0 = vcmask 261120   ;;  %v63_v0 = vld [vmem:[#allocation4] sm:$0xff]  ;;  %v64_v1 = vld [vmem:[#allocation4 + $0x8] sm:$0xff]  ;;  %vm274_vm1 = vcmask 15360  }
  0x36   :  { %v65_v2 = vld [vmem:[#allocation4 + $0x10] sm:$0xff]  ;;  %v357_v3 = vpack.c.bf16 %v64_v1, %v63_v0  ;;  %v66_v4 = vld [vmem:[#allocation4 + $0x18] sm:$0xff]  ;;  %v158_v7 = vld [vmem:[#allocation6] sm:$0xff] }
  0x37   :  { %v61_v5 = vld [vmem:[#allocation2] sm:$0xff]  ;;  %v361_v6 = vpack.c.bf16 %v66_v4, %v65_v2  ;;  %v159_v8 = vld [vmem:[#allocation6 + $0x8] sm:$0xff]  ;;  %v161_v11 = vld [vmem:[#allocation6 + $0x18] sm:$0xff] }
  0x38   :  { %319 = vmatprep.mubr.msk.f32.mxu0 %vm74_vm0, %v61_v5  ;;  %v160_v9 = vld [vmem:[#allocation6 + $0x10] sm:$0xff]  ;;  %358 = vmatprep.subr.bf16.mxu0 %v357_v3  ;;  %v365_v10 = vpack.c.bf16 %v159_v8, %v158_v7  ;;  %v162_v13 = vld [vmem:[#allocation6 + $0x20] sm:$0xff]  ;;  %v163_v14 = vld [vmem:[#allocation6 + $0x28] sm:$0xff] }
  0x39   :  { %360 = vmatpush3.bf16.msra.mxu0 %v357_v3  ;;  %v369_v12 = vpack.c.bf16 %v161_v11, %v160_v9  ;;  %v373_v15 = vpack.c.bf16 %v163_v14, %v162_v13  ;;  %v62_v16 = vld [vmem:[#allocation2 + $0x8] sm:$0xff]  ;;  %v164_v17 = vld [vmem:[#allocation6 + $0x30] sm:$0xff]  ;;  %v166_v20 = vld [vmem:[#allocation6 + $0x40] sm:$0xff] }
  0x3a   :  { %362 = vmatprep.subr.bf16.mxu0 %v361_v6  ;;  %366 = vmatprep.subr.bf16.mxu1 %v365_v10  ;;  %v165_v18 = vld [vmem:[#allocation6 + $0x38] sm:$0xff]  ;;  %v167_v21 = vld [vmem:[#allocation6 + $0x48] sm:$0xff]  ;;  %v168_v23 = vld [vmem:[#allocation6 + $0x50] sm:$0xff] }
  0x3b   :  { %368 = vmatpush3.bf16.msra.mxu1 %v365_v10  ;;  %v377_v19 = vpack.c.bf16 %v165_v18, %v164_v17  ;;  %v381_v22 = vpack.c.bf16 %v167_v21, %v166_v20  ;;  %v169_v24 = vld [vmem:[#allocation6 + $0x58] sm:$0xff]  ;;  %v170_v26 = vld [vmem:[#allocation6 + $0x60] sm:$0xff]  ;;  %v171_v27 = vld [vmem:[#allocation6 + $0x68] sm:$0xff] }
  0x3c   :  { %370 = vmatprep.subr.bf16.mxu1 %v369_v12  ;;  %v385_v25 = vpack.c.bf16 %v169_v24, %v168_v23  ;;  %v389_v28 = vpack.c.bf16 %v171_v27, %v170_v26  ;;  %v172_v29 = vld [vmem:[#allocation6 + $0x70] sm:$0xff]  ;;  %v173_v30 = vld [vmem:[#allocation6 + $0x78] sm:$0xff] }
  0x3d   :  { %364 = vmatpush3.bf16.msra.mxu0 %v361_v6  ;;  %v393_v31 = vpack.c.bf16 %v173_v30, %v172_v29  ;;  %v283_v32 = vld [vmem:[%s583_s2] ss:$0 sm:$0xff] }
  0x3e   :  { %v286_v39 = vld [vmem:[%s585_s4] ss:$0 sm:$0xff] }
  0x3f   :  { %372 = vmatpush3.bf16.msra.mxu1 %v369_v12 }
  0x40   :  { %320 = vmatmul.mubr.msk.f32.vlgmr.msra.gmra.mrb[0].mxu0 %vm74_vm0, %v62_v16  ;;  %374 = vmatprep.subr.bf16.mxu1 %v373_v15 }
  0x43   :  { %376 = vmatpush3.bf16.msra.mxu1 %v373_v15 }
  0x44   :  { %378 = vmatprep.subr.bf16.mxu1 %v377_v19 }
  0x47   :  { %380 = vmatpush3.bf16.msra.mxu1 %v377_v19 }
  0x48   :  { %382 = vmatprep.subr.bf16.mxu1 %v381_v22 }
  0x4b   :  { %384 = vmatpush3.bf16.msra.mxu1 %v381_v22 }
  0x4c   :  { %386 = vmatprep.subr.bf16.mxu1 %v385_v25 }
  0x4f   :  { %388 = vmatpush3.bf16.msra.mxu1 %v385_v25 }
  0x50   :  { %390 = vmatprep.subr.bf16.mxu1 %v389_v28 }
  0x53   :  { %392 = vmatpush3.bf16.msra.mxu1 %v389_v28 }
  0x54   :  { %394 = vmatprep.subr.bf16.mxu1 %v393_v31 }
  0x57   :  { %396 = vmatpush3.bf16.msra.mxu1 %v393_v31 }
 0x113   :  { %v321_v33 = vpop.f32.mrb[0].mxu0 }
 0x114   :  { %v153_v34 = vadd.f32 %v321_v33, %v283_v32  ;;  %v147_v35 = vpop.f32.mrb[1].mxu0 }
 0x115   :  { %v148_v36 = vadd.f32 %v283_v32, %v147_v35 }
 0x116   :  { %v157_v38 = vmax.f32 %v153_v34, 0.0 }
 0x117   :  { %v156_v37 = vmax.f32 %v148_v36, 0.0 }
 0x119   :  { %354 = vmatprep.mubr.f32.mxu1 %v156_v37 }
 0x11a   :  { %355 = vmatmul.mubr.f32.vlgmr.msra.gmra.mrb[0].mxu1 %v157_v38 }
 0x1ed   :  { %v356_v40 = vpop.f32.mrb[0].mxu1 }
 0x1ee   :  { %v247_v41 = vpop.f32.mrb[1].mxu1  ;;  %v253_v43 = vadd.f32 %v356_v40, %v286_v39 }
 0x1ef   :  { %v248_v42 = vadd.f32 %v286_v39, %v247_v41 }
 0x1f1   :  { %256 = vmax.xlane.f32.xlu0 %v248_v42 }
 0x1f5   :  { %258 = vmax.xlane.f32.xlu0 %v253_v43 }
 0x27e   :  { %v257_v44 = vpop.xlane.xlu0 %256 }
 0x27f   :  { %v260_v45 = vsub.f32 %v248_v42, %v257_v44 }
 0x281   :  { %v262_v46 = vmul.f32 1.442695, %v260_v45 }
 0x282   :  { %v259_v47 = vpop.xlane.xlu0 %258 }
 0x283   :  { %402 = vpow2.f32 %v262_v46  ;;  %v261_v48 = vsub.f32 %v253_v43, %v259_v47 }
 0x285   :  { %v264_v49 = vmul.f32 1.442695, %v261_v48 }
 0x287   :  { %404 = vpow2.f32 %v264_v49 }
 0x28d   :  { %v403_v50 = vpop.eup %402 }
 0x28e   :  { %266 = vadd.xlane.f32.xlu1 %v403_v50 }
 0x291   :  { %v405_v51 = vpop.eup %404 }
 0x292   :  { %268 = vadd.xlane.f32.xlu1 %v405_v51 }
 0x31b   :  { %v267_v52 = vpop.xlane.xlu1 %266 }
 0x31c   :  { %406 = vrcp.f32 %v267_v52 }
 0x31f   :  { %v269_v53 = vpop.xlane.xlu1 %268 }
 0x320   :  { %408 = vrcp.f32 %v269_v53 }
 0x326   :  { %v407_v54 = vpop.eup %406 }
 0x327   :  { %v271_v55 = vmul.f32 %v407_v54, %v403_v50 }
 0x329   :  { %275 = vst.msk [vmem:[%s586_s5] sm:$0xff] %vm274_vm1, %v271_v55 }
 0x32a   :  { %v409_v56 = vpop.eup %408 }
 0x32b   :  { %v273_v57 = vmul.f32 %v409_v56, %v405_v51 }
 0x32d   :  { %276 = vst.msk [vmem:[%s586_s5 + $0x8] sm:$0xff] %vm274_vm1, %v273_v57 }
 0x32e   :  { %281 = vsyncpa [#allocation3], 1 }
 0x32f   :  { %282 = vsyncpa [#allocation5], 1 }

</bundles_post_ra>
